<compile_context>
chip_gen: v7x
topology: tpu7x:2x2x1
jax: 0.10.0
libtpu: 0.0.40
codegen_flags: <defaults>
</compile_context>

<pallas_src>
import math

import jax
import jax.numpy as jnp
from jax.experimental import pallas as pl
from jax.experimental.pallas import tpu as pltpu

_BLOCK_BYTES = 4 * 1024 * 1024        # per-block cap (x tile); ~4x resident double-buffered
_VMEM_LIMIT = 32 * 1024 * 1024        # safe on v5e/v6e (128 MiB) and v7x (64 MiB)


def _drop_path_kernel(scale_ref, x_ref, o_ref):
    """scale_ref: (tile_rows, 1) f32; x_ref / o_ref: (tile_rows, lanes) in x.dtype."""
    # Compute in f32 (matches x / keep_prob to f32 precision), cast on store.
    o_ref[...] = (x_ref[...].astype(jnp.float32) * scale_ref[...]).astype(o_ref.dtype)


def _sublane_multiple(itemsize: int) -> int:
    # Native sublane packing: 8 rows for 4-byte, 16 for 2-byte, 32 for 1-byte dtypes.
    return max(8, (8 * 4) // max(1, itemsize))


def drop_path(x, drop_prob: float = 0.0, training: bool = False, seed: int = 0):
    """Pallas-backed equivalent of the PyTorch drop_path function."""
    if drop_prob == 0.0 or not training:
        return x
    keep_prob = 1.0 - drop_prob

    b = x.shape[0]
    n = int(math.prod(x.shape[1:]))
    itemsize = x.dtype.itemsize
    sub_mult = _sublane_multiple(itemsize)

    # Per-sample keep mask -> scale, torch-style: floor(keep_prob + U[0,1)) / keep_prob.
    u = jax.random.uniform(jax.random.PRNGKey(seed), (b,), dtype=jnp.float32)
    scale = jnp.floor(keep_prob + u) / keep_prob          # (B,) f32: 0.0 or 1/keep_prob

    # Pick a lane width (multiple of 128) that divides n -> no padding, no post-slice.
    lanes = None
    for cand in (1024, 512, 256, 128):
        if n % cand == 0:
            lanes = cand
            break

    x2 = x.reshape(b, n)
    if lanes is None:
        # Lane-unaligned n: minimal pad to a 128 multiple (<= 127 elems/sample).
        lanes = 128
        n_pad = -(-n // lanes) * lanes
        x2 = jnp.pad(x2, ((0, 0), (0, n_pad - n)))
    else:
        n_pad = n

    rows = n_pad // lanes
    total_rows = b * rows

    # Flatten batch into the row axis: blocks may span samples.
    x3 = x2.reshape(total_rows, lanes)
    scale_col = jnp.broadcast_to(scale[:, None], (b, rows)).reshape(total_rows, 1)

    # Row-tile size: biggest multiple of the dtype sublane packing under the block cap.
    max_rows = max(sub_mult, (_BLOCK_BYTES // (lanes * itemsize)) // sub_mult * sub_mult)
    if total_rows <= max_rows:
        tile_rows = total_rows        # block dim == full array dim -> always valid
    else:
        tile_rows = max_rows          # multiple of sub_mult; ragged last tile is masked

    grid = (pl.cdiv(total_rows, tile_rows),)

    out = pl.pallas_call(
        _drop_path_kernel,
        out_shape=jax.ShapeDtypeStruct((total_rows, lanes), x.dtype),
        grid=grid,
        in_specs=[
            pl.BlockSpec((tile_rows, 1), lambda t: (t, 0)),       # per-row scale
            pl.BlockSpec((tile_rows, lanes), lambda t: (t, 0)),   # x tile
        ],
        out_specs=pl.BlockSpec((tile_rows, lanes), lambda t: (t, 0)),
        compiler_params=pltpu.CompilerParams(
            dimension_semantics=("parallel",),
            vmem_limit_bytes=_VMEM_LIMIT,
        ),
    )(scale_col, x3)

    out = out.reshape(b, n_pad)
    if n_pad != n:
        out = out[:, :n]
    return out.reshape(x.shape)


class DropPath:
    """Mirror of the PyTorch DropPath module (no parameters)."""

    def __init__(self, drop_prob=None):
        self.drop_prob = drop_prob
        self.training = True

    def __call__(self, x, seed: int = 0):
        return drop_path(
            x,
            self.drop_prob if self.drop_prob is not None else 0.0,
            self.training,
            seed=seed,
        )


if __name__ == "__main__":
    key = jax.random.PRNGKey(0)
    # NCHW input, small shapes: batch=2, channels=4, spatial=16x16
    x = jax.random.normal(key, (2, 4, 16, 16), dtype=jnp.float32)

    # --- identity path (eval / drop_prob=0) ---
    mod_eval = DropPath(drop_prob=0.25)
    mod_eval.training = False
    y_eval = jax.block_until_ready(mod_eval(x))
    assert jnp.array_equal(y_eval, x), "eval path must be identity"

    # --- training path (kernel launched) ---
    mod_train = DropPath(drop_prob=0.25)
    mod_train.training = True
    y = jax.block_until_ready(mod_train(x, seed=123))

    # Each sample must be either all-zero or exactly x / keep_prob.
    keep_prob = 1.0 - 0.25
    ok = True
    for i in range(x.shape[0]):
        zero = bool(jnp.all(y[i] == 0.0))
        scaled = bool(jnp.allclose(y[i], x[i] / keep_prob, rtol=1e-5, atol=1e-6))
        ok = ok and (zero or scaled)
    assert ok, "per-sample output must be 0 or x/keep_prob"
    assert y.shape == x.shape and y.dtype == x.dtype

    print("KERNEL_OK")
</pallas_src>

<mosaic_0001>
module attributes {stable_mosaic.version = 11 : i64} {
  func.func @_drop_path_kernel(%arg0: i32, %arg1: memref<2x1xf32, #tpu.memory_space<vmem>>, %arg2: memref<2x1024xf32, #tpu.memory_space<vmem>>, %arg3: memref<2x1024xf32, #tpu.memory_space<vmem>>) attributes {dimension_semantics = [#tpu.dimension_semantics<parallel>], iteration_bounds = array<i64: 1>, scalar_prefetch = 0 : i64, scratch_operands = 0 : i64, tpu.core_type = #tpu.core_type<tc>, window_params = [{transform_indices = @transform_0, window_bounds = array<i64: 2, 1>}, {transform_indices = @transform_1, window_bounds = array<i64: 2, 1024>}, {transform_indices = @transform_2, window_bounds = array<i64: 2, 1024>}]} {
    %c0 = arith.constant 0 : index
    %c0_0 = arith.constant 0 : index
    %0 = vector.load %arg2[%c0, %c0_0] : memref<2x1024xf32, #tpu.memory_space<vmem>>, vector<2x1024xf32>
    %c0_1 = arith.constant 0 : index
    %c0_2 = arith.constant 0 : index
    %1 = vector.load %arg1[%c0_1, %c0_2] : memref<2x1xf32, #tpu.memory_space<vmem>>, vector<2x1xf32>
    %2 = vector.broadcast %1 : vector<2x1xf32> to vector<2x1024xf32>
    %3 = arith.mulf %0, %2 : vector<2x1024xf32>
    %c0_3 = arith.constant 0 : index
    %c0_4 = arith.constant 0 : index
    %4 = vector.load %arg3[%c0_3, %c0_4] : memref<2x1024xf32, #tpu.memory_space<vmem>>, vector<2x1024xf32>
    tpu.vector_store %arg3[%c0_3, %c0_4], %3 {strides = array<i32>} : memref<2x1024xf32, #tpu.memory_space<vmem>>, vector<2x1024xf32>,
    return
  }
  func.func @transform_0(%arg0: i32) -> (i32, i32) {
    %c0_i32 = arith.constant 0 : i32
    %c0_i32_0 = arith.constant 0 : i32
    return %arg0, %c0_i32 : i32, i32
  }
  func.func @transform_1(%arg0: i32) -> (i32, i32) {
    %c0_i32 = arith.constant 0 : i32
    %c0_i32_0 = arith.constant 0 : i32
    return %arg0, %c0_i32 : i32, i32
  }
  func.func @transform_2(%arg0: i32) -> (i32, i32) {
    %c0_i32 = arith.constant 0 : i32
    %c0_i32_0 = arith.constant 0 : i32
    return %arg0, %c0_i32 : i32, i32
  }
}

</mosaic_0001>

<bundles_post_ra>
// kernel: tpu_custom_call.1
= control target key start
LH: loop header
LB: loop body
LE: loop exit
PB: predicated region body
PF: predicated region fallthrough
CT: control target
= control target key end

     0   :  { %7 = vsyncpa [#allocation3], 0  ;;  %s157_s0 = inlined_call_operand.vmem [shape: f32[2,1], index: 0, kind: input, shape index: {}]   ;;  %s158_s1 = inlined_call_operand.hbm [shape: f32[2,1024], index: 1, kind: input, shape index: {}]   ;;  %s159_s2 = inlined_call_operand.hbm [shape: f32[2,1024], index: 2, kind: output, shape index: {}]  }
   0x1   :  { %8 = vsyncpa [#allocation4], 0  ;;  %s111_s9 = smov [#allocation2]   ;;  %s63_s13 = scalar_lea.hbm %s158_s1, 256 }
   0x2   :  { %s17_s10 = sshll.u32 %s111_s9, 4  ;;  %p64_p0 = scmp.ne.s32.totalorder %s158_s1, %s63_s13  ;;  %s18_s10 = int_to_ptr.vmem [resolvable:$true] %s17_s10 }
   0x3   :  { %p67_p1 = scmp.lt.u32.totalorder %s63_s13, %s158_s1 }
   0x5   :  { %p69_p2 = pnand %p67_p1, %p64_p0 }
   0x7   :  { %72 = shalt.err (!%p69_p2)
}
   0x8   :  { %s73_s18 = scalar_lea.vmem %s18_s10, 256  ;;  %p78_p4 = scmp.lt.s32.totalorder %s18_s10, %s18_s10 }
   0x9   :  { %p74_p3 = scmp.ne.s32.totalorder %s18_s10, %s73_s18  ;;  %p79_p5 = scmp.lt.s32.totalorder %s73_s18, %s73_s18 }
   0xb   :  { %p80_p6 = por %p79_p5, %p78_p4 }
   0xd   :  { %p81_p7 = pnand %p80_p6, %p74_p3 }
   0xf   :  { %84 = shalt.err (!%p81_p7)
}
  0x10   :  { %20 = dma.hbm_to_vmem [thread:$0]  %s158_s1, 256, %s18_s10, [#allocation3]  }
  0x11   :  { %107 = dma.done.wait [#allocation3], 256  }
  0x12   :  { %108 = vsyncadd [#allocation3], 4294967040  ;;  %v112_v0 = vmov 0   ;;  %v26_v1 = vld [vmem:[%s157_s0] sm:$0x3]  ;;  %v34_v4 = vlaneseq  ;;  %v25_v10 = vld [vmem:[#allocation2 + $0x8] sm:$0xff] }
  0x13   :  { %62 = vset.pattern.permute.xlu0 %v112_v0  ;;  %v113_v2 = vmov 269488144   ;;  %v24_v9 = vld [vmem:[#allocation2] sm:$0xff]  ;;  %s114_s23 = smov [#allocation5]  }
  0x14   :  { %29 = vperm.xlu0 %62, %v26_v1   ;;  %v32_v3 = vunpack.c.l.s4 %v113_v2  ;;  %v35_v6 = vshrl.u32 %v34_v4, 7  ;;  %s49_s1 = sshll.u32 %s114_s23, 4  ;;  %s50_s1 = int_to_ptr.vmem [resolvable:$true] %s49_s1 }
  0x15   :  { %s85_s24 = scalar_lea.vmem %s50_s1, 256  ;;  %p90_p9 = scmp.lt.s32.totalorder %s50_s1, %s50_s1 }
  0x16   :  { %v33_v5 = vunpack.c.0.s8 %v32_v3  ;;  %p86_p8 = scmp.ne.s32.totalorder %s50_s1, %s85_s24  ;;  %p91_p10 = scmp.lt.s32.totalorder %s85_s24, %s85_s24 }
  0x18   :  { %v36_v7 = vsub.s32 %v33_v5, %v35_v6  ;;  %p92_p11 = por %p91_p10, %p90_p9 }
  0x1a   :  { %p93_p12 = pnand %p92_p11, %p86_p8 }
  0x93   :  { %v30_v8 = vpop.permute.xlu0 %29 }
  0x94   :  { %v37_v11 = vrot.slane %v30_v8, %v36_v7 }
  0x96   :  { %v39_v12 = vmul.f32 %v37_v11, %v24_v9  ;;  %v40_v13 = vmul.f32 %v37_v11, %v25_v10 }
  0x98   :  { %41 = vst [vmem:[#allocation5] sm:$0xff] %v39_v12  ;;  %42 = vst [vmem:[#allocation5 + $0x8] sm:$0xff] %v40_v13 }
  0x99   :  { %96 = shalt.err (!%p93_p12)
}
  0x9a   :  { %s97_s26 = scalar_lea.hbm %s159_s2, 256 }
  0x9b   :  { %p98_p13 = scmp.ne.s32.totalorder %s159_s2, %s97_s26  ;;  %p101_p0 = scmp.lt.u32.totalorder %s97_s26, %s159_s2 }
  0x9d   :  { %p103_p1 = pnand %p101_p0, %p98_p13 }
  0x9f   :  { %106 = shalt.err (!%p103_p1)
}
  0xa0   :  { %52 = dma.vmem_to_hbm [thread:$0]  %s50_s1, 256, %s159_s2, [#allocation4]  }
  0xa1   :  { %109 = dma.done.wait [#allocation4], 256  }
  0xa2   :  { %110 = vsyncadd [#allocation4], 4294967040 }
  0xa3   :  { %56 = vsyncpa [#allocation3], 1 }
  0xa4   :  { %57 = vsyncpa [#allocation4], 1 }

</bundles_post_ra>
